<compile_context>
chip_gen: v5e
topology: v5e:2x2
jax: 0.10.0
libtpu: 0.0.40
codegen_flags: <defaults>
</compile_context>

<pallas_src>
import jax
import jax.numpy as jnp
from jax.experimental import pallas as pl
from jax.experimental.pallas import tpu as pltpu


def linear_kernel(w_ref, b_ref, x_ref, o_ref):
    # w_ref: [K] f32 in SMEM, b_ref: [1] f32 in SMEM
    # x_ref: [K, TB] f32 in VMEM (K on sublanes, batch on lanes)
    # o_ref: [1, TB] f32 in VMEM (lane-dense output tile)
    #
    # Single fused expression, written once to o_ref -> Mosaic streams it
    # vreg-by-vreg; no large live accumulator state even at TB >= 128K.
    k_dim = x_ref.shape[0]
    acc = x_ref[0:1, :] * w_ref[0]
    for k in range(1, k_dim):            # static unroll, K = 5
        acc = acc + x_ref[k:k + 1, :] * w_ref[k]
    o_ref[...] = (acc + b_ref[0]).astype(o_ref.dtype)


def _round_up(n, m):
    return ((n + m - 1) // m) * m


# Largest tile that keeps 2x double-buffered (x + out) comfortably inside
# v5e's 16 MiB default scoped VMEM (48 * TB bytes ~= 6 MiB at 128K) and is
# safe on v7x's smaller VMEM as well.
_MAX_TB = 131072
_DEFAULT_TB = 65536
_SMALL_B_FALLBACK = 4096


def _pick_tb(B, tb):
    """Pick a lane-dense batch tile: multiple of 128, big enough to amortize
    per-step overhead, small enough for >=2 grid steps (v7x TC balance) and
    the v5e scoped-VMEM budget."""
    if tb is None:
        tb = _DEFAULT_TB
    tb = _round_up(min(tb, _MAX_TB), 128)
    half = _round_up(pl.cdiv(B, 2), 128)       # ensure >= 2 grid steps at large B
    tb = max(128, min(tb, half))
    tb = min(tb, _round_up(B, 128))            # never bigger than the padded batch
    return tb


def my_network_forward(x, weight, bias, *, tb=None, force_kernel=False):
    """x: [B, 5] f32, weight: [1, 5] f32 (PyTorch layout), bias: [1] f32 -> [B, 1]."""
    B, K = x.shape
    OUT = weight.shape[0]
    assert OUT == 1 and weight.shape[1] == K, "kernel is specialized to Linear(5, 1)"
    assert x.dtype == jnp.float32, "kernel validated for f32 only"
    # TODO(synk): bf16 inputs would need re-validation against 16-sublane tiling.

    # Small-batch fast path: pallas_call launch overhead (us-scale) dominates
    # ~10*B FLOPs of work; fused XLA matmul is the honest fastest path there.
    if B < _SMALL_B_FALLBACK and not force_kernel:
        return x @ weight.T + bias

    tb = _pick_tb(B, tb)
    num_blocks = pl.cdiv(B, tb)

    # Lane-dense layout: batch on the lane axis. No padding copy: the last
    # (partial) block reads/writes out of bounds; OOB stores are masked and
    # OOB lanes are discarded by the [:B] slice below.
    x_t = x.T                                   # [K, B]
    w_flat = weight.reshape(-1)                 # [K] scalars for SMEM

    out = pl.pallas_call(
        linear_kernel,
        out_shape=jax.ShapeDtypeStruct((1, B), x.dtype),
        grid=(num_blocks,),
        in_specs=[
            pl.BlockSpec(memory_space=pltpu.SMEM),        # weight: 5 SMEM scalars
            pl.BlockSpec(memory_space=pltpu.SMEM),        # bias: 1 SMEM scalar
            pl.BlockSpec((K, tb), lambda i: (0, i)),      # x tile [5, TB], lane-dense
        ],
        out_specs=pl.BlockSpec((1, tb), lambda i: (0, i)),  # out tile [1, TB], lane-dense
        compiler_params=pltpu.CompilerParams(
            dimension_semantics=("parallel",)),
        cost_estimate=pl.CostEstimate(
            flops=2 * K * B,
            transcendentals=0,
            bytes_accessed=4 * (K * B + B + K + 1)),
    )(w_flat, bias, x_t)

    return out[0, :B].reshape(B, OUT)


if __name__ == "__main__":
    key = jax.random.PRNGKey(0)
    kx, kw, kb, kx2 = jax.random.split(key, 4)

    B, IN, OUT = 8, 5, 1

    # Deterministic parameter init (mimics PyTorch's uniform(-1/sqrt(in), 1/sqrt(in))).
    bound = 1.0 / jnp.sqrt(jnp.float32(IN))
    weight = jax.random.uniform(kw, (OUT, IN), jnp.float32, -bound, bound)
    bias = jax.random.uniform(kb, (OUT,), jnp.float32, -bound, bound)

    # Small case (matches the module's toy usage); force the Pallas kernel so
    # the TPU path is actually exercised despite the small-B fast path.
    x = jax.random.normal(kx, (B, IN), jnp.float32)
    y = my_network_forward(x, weight, bias, force_kernel=True)
    jax.block_until_ready(y)
    y_ref = x @ weight.T + bias
    assert y.shape == (B, OUT)
    assert jnp.allclose(y, y_ref, atol=1e-5, rtol=1e-5)

    # Small-B XLA fast path sanity check.
    y_fast = my_network_forward(x, weight, bias)
    jax.block_until_ready(y_fast)
    assert jnp.allclose(y_fast, y_ref, atol=1e-5, rtol=1e-5)

    # Non-multiple-of-tile case: exercises the >=2-step grid and the masked
    # partial last block (no jnp.pad copy).
    B2 = 1000
    x2 = jax.random.normal(kx2, (B2, IN), jnp.float32)
    y2 = my_network_forward(x2, weight, bias, force_kernel=True)  # tb=512, grid=(2,)
    jax.block_until_ready(y2)
    y2_ref = x2 @ weight.T + bias
    assert y2.shape == (B2, OUT)
    assert jnp.allclose(y2, y2_ref, atol=1e-5, rtol=1e-5)

    print("KERNEL_OK")
</pallas_src>

<mosaic_0001>
module attributes {stable_mosaic.version = 11 : i64} {
  func.func @linear_kernel(%arg0: i32, %arg1: memref<5xf32, #tpu.memory_space<smem>>, %arg2: memref<1xf32, #tpu.memory_space<smem>>, %arg3: memref<5x128xf32, #tpu.memory_space<vmem>>, %arg4: memref<1x128xf32, #tpu.memory_space<vmem>>) attributes {dimension_semantics = [#tpu.dimension_semantics<parallel>], iteration_bounds = array<i64: 1>, scalar_prefetch = 0 : i64, scratch_operands = 0 : i64, tpu.core_type = #tpu.core_type<tc>, window_params = [{transform_indices = @transform_0, window_bounds = array<i64: 5>}, {transform_indices = @transform_1, window_bounds = array<i64: 1>}, {transform_indices = @transform_2, window_bounds = array<i64: 5, 128>}, {transform_indices = @transform_3, window_bounds = array<i64: 1, 128>}]} {
    %c0 = arith.constant 0 : index
    %c0_0 = arith.constant 0 : index
    %0 = vector.load %arg3[%c0, %c0_0] : memref<5x128xf32, #tpu.memory_space<vmem>>, vector<1x128xf32>
    %c0_1 = arith.constant 0 : index
    %1 = memref.load %arg1[%c0_1] : memref<5xf32, #tpu.memory_space<smem>>
    %2 = vector.broadcast %1 : f32 to vector<1x128xf32>
    %3 = arith.mulf %0, %2 : vector<1x128xf32>
    %c1 = arith.constant 1 : index
    %c0_2 = arith.constant 0 : index
    %4 = vector.load %arg3[%c1, %c0_2] : memref<5x128xf32, #tpu.memory_space<vmem>>, vector<1x128xf32>
    %c1_3 = arith.constant 1 : index
    %5 = memref.load %arg1[%c1_3] : memref<5xf32, #tpu.memory_space<smem>>
    %6 = vector.broadcast %5 : f32 to vector<1x128xf32>
    %7 = arith.mulf %4, %6 : vector<1x128xf32>
    %8 = arith.addf %3, %7 : vector<1x128xf32>
    %c2 = arith.constant 2 : index
    %c0_4 = arith.constant 0 : index
    %9 = vector.load %arg3[%c2, %c0_4] : memref<5x128xf32, #tpu.memory_space<vmem>>, vector<1x128xf32>
    %c2_5 = arith.constant 2 : index
    %10 = memref.load %arg1[%c2_5] : memref<5xf32, #tpu.memory_space<smem>>
    %11 = vector.broadcast %10 : f32 to vector<1x128xf32>
    %12 = arith.mulf %9, %11 : vector<1x128xf32>
    %13 = arith.addf %8, %12 : vector<1x128xf32>
    %c3 = arith.constant 3 : index
    %c0_6 = arith.constant 0 : index
    %14 = vector.load %arg3[%c3, %c0_6] : memref<5x128xf32, #tpu.memory_space<vmem>>, vector<1x128xf32>
    %c3_7 = arith.constant 3 : index
    %15 = memref.load %arg1[%c3_7] : memref<5xf32, #tpu.memory_space<smem>>
    %16 = vector.broadcast %15 : f32 to vector<1x128xf32>
    %17 = arith.mulf %14, %16 : vector<1x128xf32>
    %18 = arith.addf %13, %17 : vector<1x128xf32>
    %c4 = arith.constant 4 : index
    %c0_8 = arith.constant 0 : index
    %19 = vector.load %arg3[%c4, %c0_8] : memref<5x128xf32, #tpu.memory_space<vmem>>, vector<1x128xf32>
    %c4_9 = arith.constant 4 : index
    %20 = memref.load %arg1[%c4_9] : memref<5xf32, #tpu.memory_space<smem>>
    %21 = vector.broadcast %20 : f32 to vector<1x128xf32>
    %22 = arith.mulf %19, %21 : vector<1x128xf32>
    %23 = arith.addf %18, %22 : vector<1x128xf32>
    %c0_10 = arith.constant 0 : index
    %24 = memref.load %arg2[%c0_10] : memref<1xf32, #tpu.memory_space<smem>>
    %25 = vector.broadcast %24 : f32 to vector<1x128xf32>
    %26 = arith.addf %23, %25 : vector<1x128xf32>
    %c0_11 = arith.constant 0 : index
    %c0_12 = arith.constant 0 : index
    %27 = vector.load %arg4[%c0_11, %c0_12] : memref<1x128xf32, #tpu.memory_space<vmem>>, vector<1x128xf32>
    tpu.vector_store %arg4[%c0_11, %c0_12], %26 {strides = array<i32>} : memref<1x128xf32, #tpu.memory_space<vmem>>, vector<1x128xf32>,
    return
  }
  func.func @transform_0(%arg0: i32) -> i32 {
    %c0_i32 = arith.constant 0 : i32
    %c0_i32_0 = arith.constant 0 : i32
    return %c0_i32 : i32
  }
  func.func @transform_1(%arg0: i32) -> i32 {
    %c0_i32 = arith.constant 0 : i32
    %c0_i32_0 = arith.constant 0 : i32
    return %c0_i32 : i32
  }
  func.func @transform_2(%arg0: i32) -> (i32, i32) {
    %c0_i32 = arith.constant 0 : i32
    %c0_i32_0 = arith.constant 0 : i32
    return %c0_i32, %arg0 : i32, i32
  }
  func.func @transform_3(%arg0: i32) -> (i32, i32) {
    %c0_i32 = arith.constant 0 : i32
    %c0_i32_0 = arith.constant 0 : i32
    return %c0_i32, %arg0 : i32, i32
  }
}

</mosaic_0001>

<bundles_post_ra>
// kernel: tpu_custom_call.1
= control target key start
LH: loop header
LB: loop body
LE: loop exit
PB: predicated region body
PF: predicated region fallthrough
CT: control target
= control target key end

     0   :  { %9 = vsyncpa [#allocation6], 0  ;;  %s197_s0 = inlined_call_operand.vmem [shape: f32[5], index: 0, kind: input, shape index: {}]   ;;  %s198_s1 = inlined_call_operand.<no memory space> [shape: f32[1], index: 1, kind: input, shape index: {}]   ;;  %s199_s2 = inlined_call_operand.hbm [shape: f32[5,8], index: 2, kind: input, shape index: {}]   ;;  %s200_s3 = inlined_call_operand.hbm [shape: f32[1,8], index: 3, kind: output, shape index: {}]  }
   0x1   :  { %10 = vsyncpa [#allocation4], 0 }
   0x2   :  { %11 = vsyncpa [#allocation5], 0  ;;  %s17_s14 = sshll.u32 %s197_s0, 4  ;;  %s28_s17 = sshll.u32 %s199_s2, 4  ;;  %s18_s14 = int_to_ptr.vmem [resolvable:$true] %s17_s14  ;;  %s29_s17 = int_to_ptr.hbm [resolvable:$true] %s28_s17 }
   0x3   :  { %s162_s18 = smov [#allocation3]   ;;  %s163_s19 = smov [#allocation7]  }
   0x4   :  { %20 = dma.vmem_to_smem %s18_s14, 16, %s162_s18, [#allocation6]  }
   0x5   :  { %s30_s20 = sshll.u32 %s163_s19, 4  ;;  %s31_s20 = int_to_ptr.vmem [resolvable:$true] %s30_s20 }
   0x6   :  { %33 = dma.hbm_to_vmem [thread:$0]  %s29_s17, 128, %s31_s20, [#allocation4]  }
   0x7   :  { %156 = dma.done.wait [#allocation6], 16  }
   0x8   :  { %157 = vsyncadd [#allocation6], 4294967280 }
   0x9   :  { %158 = dma.done.wait [#allocation4], 128  }
   0xa   :  { %159 = vsyncadd [#allocation4], 4294967168 }
   0xb   :  { %42 = sfence }
   0xc   :  { %s44_s21 = sld [smem:[#allocation3]]  ;;  %v43_v0 = vld [vmem:[#allocation7] sm:$0x1]  ;;  %v47_v1 = vld [vmem:[#allocation7 + $0x1] sm:$0x1]  ;;  %v68_v18 = vstv %s198_s1  ;;  %s164_s26 = smov [#allocation8]  }
   0xd   :  { %s89_s22 = sld [smem:[#allocation3 + $0x1]]  ;;  %v52_v3 = vld [vmem:[#allocation7 + $0x2] sm:$0x1]  ;;  %v57_v6 = vld [vmem:[#allocation7 + $0x3] sm:$0x1]  ;;  %s76_s27 = sshll.u32 %s164_s26, 4  ;;  %s77_s27 = int_to_ptr.vmem [resolvable:$true] %s76_s27 }
   0xe   :  { %s90_s0 = sld [smem:[#allocation3 + $0x2]]  ;;  %v62_v11 = vld [vmem:[#allocation7 + $0x4] sm:$0x1]  ;;  %s78_s30 = sshll.u32 %s200_s3, 4  ;;  %s79_s30 = int_to_ptr.hbm [resolvable:$true] %s78_s30 }
   0xf   :  { %s91_s23 = sld [smem:[#allocation3 + $0x3]] }
  0x10   :  { %s92_s24 = sld [smem:[#allocation3 + $0x4]] }
  0x12   :  { %v45_v2 = vstv %s44_s21 }
  0x13   :  { %v46_v4 = vmul.f32 %v45_v2, %v43_v0  ;;  %v49_v5 = vstv %s89_s22 }
  0x14   :  { %v50_v7 = vmul.f32 %v49_v5, %v47_v1  ;;  %v54_v8 = vstv %s90_s0 }
  0x15   :  { %v55_v9 = vmul.f32 %v54_v8, %v52_v3  ;;  %v59_v10 = vstv %s91_s23 }
  0x16   :  { %v51_v12 = vadd.f32 %v50_v7, %v46_v4  ;;  %v60_v13 = vmul.f32 %v59_v10, %v57_v6  ;;  %v64_v14 = vstv %s92_s24 }
  0x17   :  { %v65_v16 = vmul.f32 %v64_v14, %v62_v11 }
  0x18   :  { %v56_v15 = vadd.f32 %v55_v9, %v51_v12 }
  0x1a   :  { %v61_v17 = vadd.f32 %v60_v13, %v56_v15 }
  0x1c   :  { %v66_v19 = vadd.f32 %v65_v16, %v61_v17 }
  0x1e   :  { %v69_v20 = vadd.f32 %v68_v18, %v66_v19 }
  0x20   :  { %70 = vst [vmem:[#allocation8] sm:$0x1] %v69_v20 }
  0x21   :  { %81 = dma.vmem_to_hbm [thread:$0]  %s77_s27, 16, %s79_s30, [#allocation5]  }
  0x22   :  { %160 = dma.done.wait [#allocation5], 16  }
  0x23   :  { %161 = vsyncadd [#allocation5], 4294967280 }
  0x24   :  { %86 = vsyncpa [#allocation4], 1 }
  0x25   :  { %87 = vsyncpa [#allocation5], 1 }
  0x26   :  { %88 = vsyncpa [#allocation6], 1 }

</bundles_post_ra>
